<compile_context>
chip_gen: v6e
topology: v6e:2x2x1
jax: 0.10.0
libtpu: 0.0.40
codegen_flags: <defaults>
</compile_context>

<pallas_src>
import functools
import math

import jax
import jax.numpy as jnp
from jax.experimental import pallas as pl
from jax.experimental.pallas import tpu as pltpu

_NEG_BIG = -1e30  # safe only because scores are kept in f32


def _vmem_budget_bytes():
    """Generation-aware (budget, compiler limit): v7x 64 MiB VMEM, v5e/v6e 128 MiB."""
    cap = 64 << 20  # conservative fallback (v7x per-TC size)
    try:
        info = pltpu.get_tpu_info()
        cap_q = getattr(info, "vmem_capacity_bytes", None)
        if cap_q:
            cap = int(cap_q)
    except Exception:
        pass
    budget = min(cap * 3 // 4, cap - (24 << 20))   # ~40 MiB on v7x, ~96 MiB on v5e/v6e
    budget = max(budget, 24 << 20)
    limit = min(budget + (8 << 20), cap - (8 << 20))
    return budget, limit


def _choose_tiling(b, c, l_pad, x_bytes, out_bytes, budget):
    """Pick (batch block bt, query tile tq) fitting the VMEM budget."""

    def fits(bt, tq):
        est = (
            2 * bt * tq * l_pad * out_bytes        # double-buffered output block
            + 2 * bt * c * l_pad * x_bytes         # double-buffered key slab
            + 2 * c * c * 4                        # folded M (double-buffered, f32)
            + bt * (2 * tq * l_pad + tq * c) * 4   # s/p + tmp f32 intermediates
            + bt * c * tq * x_bytes                # in-kernel query slice
        )
        return est <= budget

    n128 = l_pad // 128
    # Query-tile candidates: every multiple of 128 that divides l_pad (largest first),
    # so an odd multiple of 128 no longer forces TQ=128.
    cands = sorted((128 * d for d in range(1, n128 + 1) if n128 % d == 0), reverse=True)
    tq = 128
    for t in cands:
        if fits(1, t):
            tq = t
            break
    # TODO(synk): for L so large that even TQ=128 does not fit, stream the key axis on a
    # third "arbitrary" grid dim with a flash-style running softmax.

    bt = 1
    if tq == l_pad and l_pad <= 1024:
        # Whole key axis handled in one query step: batch several b per grid step to
        # amortize per-step pipeline overhead and fill the MXU M dimension.
        for cand in range(min(b, 8), 1, -1):
            if b % cand == 0 and fits(cand, tq):
                bt = cand
                break
    return bt, tq


def _graph_edge_kernel(x_ref, m_ref, attn_ref, *, tq, l_valid):
    """x_ref: (bt, C, L_pad) data slab; m_ref: (C, C) folded scale*W_q@W_k^T."""
    bt, _, l_pad = x_ref.shape
    start = pl.multiple_of(pl.program_id(1) * tq, 128)
    m = m_ref[...]                                             # (C, C)

    for i in range(bt):                                        # static, small (<= 8)
        xq = x_ref[i, :, pl.ds(start, tq)]                     # (C, tq) query slice of resident slab
        xk = x_ref[i]                                          # (C, l_pad) key slab
        # tmp[q, c'] = sum_c xq[c, q] * m[c, c']
        tmp = jax.lax.dot_general(xq, m, (((0,), (0,)), ((), ())),
                                  preferred_element_type=jnp.float32)   # (tq, C)
        if xk.dtype != jnp.float32:
            tmp = tmp.astype(xk.dtype)                         # keep the big dot dtype-uniform
        # s[q, k] = sum_c tmp[q, c] * xk[c, k]  — the big (tq,C)x(C,L_pad) MXU matmul
        s = jax.lax.dot_general(tmp, xk, (((1,), (0,)), ((), ())),
                                preferred_element_type=jnp.float32)     # (tq, l_pad)

        if l_pad > l_valid:  # static trace-time branch: mask padded key columns
            col = jax.lax.broadcasted_iota(jnp.int32, s.shape, 1)
            s = jnp.where(col < l_valid, s, _NEG_BIG)

        # Numerically stable softmax over keys (f32); reciprocal runs on the EUP slot.
        mx = jnp.max(s, axis=-1, keepdims=True)
        p = jnp.exp(s - mx)
        denom = jnp.sum(p, axis=-1, keepdims=True)
        attn_ref[i] = (p * pl.reciprocal(denom, approx=True)).astype(attn_ref.dtype)


def graph_edge_feature(data_x, w_qk, *, dim_head=32, matmul_dtype=None,
                       edge_dtype=jnp.bfloat16, crop=True):
    """data_x: (B, C, L), w_qk: (C, 2*inner). Returns softmax attention (B, L, L)."""
    B, C, L = data_x.shape
    inner = w_qk.shape[1] // 2
    scale = dim_head ** (-0.5)

    # Fold W_q @ W_k^T (and the softmax scale) into a single (C, C) matrix, once, in f32:
    # s = x_q^T @ M @ x_k.  Kills the per-tile key projection entirely.
    w_q = w_qk[:, :inner].astype(jnp.float32)
    w_k = w_qk[:, inner:].astype(jnp.float32)
    m = scale * (w_q @ w_k.T)

    l_pad = pl.cdiv(L, 128) * 128                 # lane-dense key/output axis
    if l_pad != L:
        data_x = jnp.pad(data_x, ((0, 0), (0, 0), (0, l_pad - L)))

    if matmul_dtype is not None:
        # Cast ONCE in the wrapper (bf16 inputs matter most on v5e); note: bf16 M adds
        # ~0.5% relative score error vs the f32 fold.
        data_x = data_x.astype(matmul_dtype)
        m = m.astype(matmul_dtype)

    x_bytes = jnp.dtype(data_x.dtype).itemsize
    out_bytes = jnp.dtype(edge_dtype).itemsize
    budget, vmem_limit = _vmem_budget_bytes()
    bt, tq = _choose_tiling(B, C, l_pad, x_bytes, out_bytes, budget)
    grid = (B // bt, l_pad // tq)

    kernel = functools.partial(_graph_edge_kernel, tq=tq, l_valid=L)

    attn = pl.pallas_call(
        kernel,
        out_shape=jax.ShapeDtypeStruct((B, l_pad, l_pad), edge_dtype),
        grid_spec=pltpu.PrefetchScalarGridSpec(
            num_scalar_prefetch=0,
            grid=grid,
            in_specs=[
                # Single data_x stream: key slab, resident across the q axis;
                # the per-tile query slice is taken in-kernel.
                pl.BlockSpec((bt, C, l_pad), lambda b, q: (b, 0, 0)),
                pl.BlockSpec((C, C), lambda b, q: (0, 0)),       # folded M
            ],
            out_specs=pl.BlockSpec((bt, tq, l_pad), lambda b, q: (b, q, 0)),
        ),
        compiler_params=pltpu.CompilerParams(
            dimension_semantics=("parallel", "parallel"),
            vmem_limit_bytes=vmem_limit,
        ),
    )(data_x, m)

    if crop and l_pad != L:
        # TODO(synk): for non-aligned L this crop is an extra O(L^2) HBM round-trip;
        # pass crop=False and mask in the consumer when possible.
        attn = attn[:, :L, :L]
    return attn


def graph_embedding_forward(x, w_qk, *, dim_head=32, matmul_dtype=None,
                            edge_dtype=jnp.bfloat16):
    """x: (B, C, D, H, W), w_qk: (C, 2*inner). Returns (node_embeds, edge_embeds, padding_mask)."""
    B, C, D, H, W = x.shape
    L = D * H * W

    data_x = x.reshape(B, C, L)                  # node_embeds (identity node feature)
    padding_mask = data_x[:, :, 0] == 0.0        # matches torch .eq(0)
    node_embeds = data_x

    edge_embeds = graph_edge_feature(
        data_x, w_qk, dim_head=dim_head,
        matmul_dtype=matmul_dtype, edge_dtype=edge_dtype)

    return node_embeds, edge_embeds, padding_mask


if __name__ == "__main__":
    # Small shapes consistent with the module:
    #   feat_dim (= channel dim C) must be a multiple of 32 so heads = feat_dim // 32 >= 1.
    B, C, D, H, W = 2, 32, 2, 4, 4      # feat_dim = 32 -> heads = 1, dim_head = 32, inner = 32
    feat_dim = C
    dim_head = 32
    heads = feat_dim // 32
    inner_dim = dim_head * heads
    num_layers = 24

    key = jax.random.PRNGKey(0)
    k_x, k_wqk = jax.random.split(key)

    x = jax.random.normal(k_x, (B, C, D, H, W), dtype=jnp.float32)

    # to_qk: Linear(dim, inner_dim*2, bias=False); torch init normal(0, 0.02/sqrt(num_layers)).
    # Stored directly in (in, out) = (C, 2*inner) layout (i.e. already transposed vs torch).
    w_qk = (0.02 / math.sqrt(num_layers)) * jax.random.normal(
        k_wqk, (feat_dim, 2 * inner_dim), dtype=jnp.float32)
    # TODO(synk): to_out Linear, emb_layer_norm and dropout are defined in __init__ but never
    # used in this forward path, so they are not materialized here.

    node_embeds, edge_embeds, padding_mask = graph_embedding_forward(
        x, w_qk, dim_head=dim_head)
    jax.block_until_ready((node_embeds, edge_embeds, padding_mask))

    L = D * H * W
    assert node_embeds.shape == (B, C, L)
    assert edge_embeds.shape == (B, L, L)
    assert padding_mask.shape == (B, C)

    # Pure-JAX reference check of the edge (attention) path.
    data_x = x.reshape(B, C, L)
    xe = jnp.transpose(data_x, (0, 2, 1))
    qk = xe @ w_qk
    q_ref, k_ref = qk[..., :inner_dim], qk[..., inner_dim:]
    attn_ref = jax.nn.softmax(
        jnp.einsum('bqc,bkc->bqk', q_ref, k_ref) * dim_head ** (-0.5), axis=-1)
    edge_f32 = edge_embeds.astype(jnp.float32)
    # bf16 output + approx reciprocal => slightly loose tolerances
    assert jnp.allclose(edge_f32, attn_ref, atol=4e-3, rtol=3e-2)
    assert jnp.allclose(jnp.sum(edge_f32, axis=-1), 1.0, atol=1e-2)
    assert jnp.array_equal(padding_mask, data_x[:, :, 0] == 0.0)

    print("KERNEL_OK")
</pallas_src>

<mosaic_0001>
module attributes {stable_mosaic.version = 11 : i64} {
  func.func @_graph_edge_kernel(%arg0: i32, %arg1: i32, %arg2: memref<2x32x128xf32, #tpu.memory_space<vmem>>, %arg3: memref<32x32xf32, #tpu.memory_space<vmem>>, %arg4: memref<2x128x128xbf16, #tpu.memory_space<vmem>>) attributes {dimension_semantics = [#tpu.dimension_semantics<parallel>, #tpu.dimension_semantics<parallel>], iteration_bounds = array<i64: 1, 1>, scalar_prefetch = 0 : i64, scratch_operands = 0 : i64, tpu.core_type = #tpu.core_type<tc>, window_params = [{transform_indices = @transform_0, window_bounds = array<i64: 2, 32, 128>}, {pipeline_mode = #tpu.pipeline_mode<synchronous>, transform_indices = @transform_1, window_bounds = array<i64: 32, 32>}, {transform_indices = @transform_2, window_bounds = array<i64: 2, 128, 128>}]} {
    %c128_i32 = arith.constant 128 : i32
    %0 = arith.muli %arg1, %c128_i32 : i32
    %1 = tpu.assume_multiple %0, 128 : i32
    %c0 = arith.constant 0 : index
    %c0_0 = arith.constant 0 : index
    %2 = vector.load %arg3[%c0, %c0_0] : memref<32x32xf32, #tpu.memory_space<vmem>>, vector<32x32xf32>
    %c0_1 = arith.constant 0 : index
    %c0_2 = arith.constant 0 : index
    %3 = arith.index_cast %1 : i32 to index
    %4 = vector.load %arg2[%c0_1, %c0_2, %3] : memref<2x32x128xf32, #tpu.memory_space<vmem>>, vector<1x32x128xf32>
    %5 = vector.shape_cast %4 : vector<1x32x128xf32> to vector<32x128xf32>
    %c0_3 = arith.constant 0 : index
    %c0_4 = arith.constant 0 : index
    %c0_5 = arith.constant 0 : index
    %6 = vector.load %arg2[%c0_3, %c0_4, %c0_5] : memref<2x32x128xf32, #tpu.memory_space<vmem>>, vector<1x32x128xf32>
    %7 = vector.shape_cast %6 : vector<1x32x128xf32> to vector<32x128xf32>
    %cst = arith.constant dense<0.000000e+00> : vector<128x32xf32>
    %8 = tpu.matmul %5, %2, %cst {dimension_numbers = #tpu.dot_dimension_numbers<[0], [0], [1], [1], [0, 1, 1, 1], [], []>} : vector<32x128xf32>, vector<32x32xf32>, vector<128x32xf32> -> vector<128x32xf32>
    %cst_6 = arith.constant dense<0.000000e+00> : vector<128x128xf32>
    %9 = tpu.matmul %8, %7, %cst_6 {dimension_numbers = #tpu.dot_dimension_numbers<[1], [0], [0], [1], [0, 0, 1, 1], [], []>} : vector<128x32xf32>, vector<32x128xf32>, vector<128x128xf32> -> vector<128x128xf32>
    %10 = tpu.iota {dimensions = array<i32: 1>} : vector<128x128xi32>
    %c32_i32 = arith.constant 32 : i32
    %11 = vector.broadcast %c32_i32 : i32 to vector<128x128xi32>
    %12 = arith.cmpi slt, %10, %11 : vector<128x128xi32>
    %cst_7 = arith.constant -1.000000e+30 : f32
    %13 = vector.broadcast %cst_7 : f32 to vector<128x128xf32>
    %14 = arith.select %12, %9, %13 : vector<128x128xi1>, vector<128x128xf32>
    %cst_8 = arith.constant dense<0xFF800000> : vector<128xf32>
    %15 = vector.multi_reduction <maximumf>, %14, %cst_8 [1] : vector<128x128xf32> to vector<128xf32>
    %16 = vector.shape_cast %15 : vector<128xf32> to vector<128x1xf32>
    %17 = vector.broadcast %16 : vector<128x1xf32> to vector<128x128xf32>
    %18 = arith.subf %14, %17 : vector<128x128xf32>
    %19 = math.exp %18 : vector<128x128xf32>
    %cst_9 = arith.constant dense<0.000000e+00> : vector<128xf32>
    %20 = vector.multi_reduction <add>, %19, %cst_9 [1] : vector<128x128xf32> to vector<128xf32>
    %21 = vector.shape_cast %20 : vector<128xf32> to vector<128x1xf32>
    %22 = tpu.reciprocal %21 {approx = true} : vector<128x1xf32> -> vector<128x1xf32>
    %23 = vector.broadcast %22 : vector<128x1xf32> to vector<128x128xf32>
    %24 = arith.mulf %19, %23 : vector<128x128xf32>
    %25 = arith.truncf %24 : vector<128x128xf32> to vector<128x128xbf16>
    %c0_10 = arith.constant 0 : index
    %c0_11 = arith.constant 0 : index
    %c0_12 = arith.constant 0 : index
    %26 = vector.load %arg4[%c0_10, %c0_11, %c0_12] : memref<2x128x128xbf16, #tpu.memory_space<vmem>>, vector<1x128x128xbf16>
    %27 = vector.shape_cast %26 : vector<1x128x128xbf16> to vector<128x128xbf16>
    %28 = vector.shape_cast %25 : vector<128x128xbf16> to vector<1x128x128xbf16>
    tpu.vector_store %arg4[%c0_10, %c0_11, %c0_12], %28 {strides = array<i32>} : memref<2x128x128xbf16, #tpu.memory_space<vmem>>, vector<1x128x128xbf16>,
    %c1 = arith.constant 1 : index
    %c0_13 = arith.constant 0 : index
    %29 = arith.index_cast %1 : i32 to index
    %30 = vector.load %arg2[%c1, %c0_13, %29] : memref<2x32x128xf32, #tpu.memory_space<vmem>>, vector<1x32x128xf32>
    %31 = vector.shape_cast %30 : vector<1x32x128xf32> to vector<32x128xf32>
    %c1_14 = arith.constant 1 : index
    %c0_15 = arith.constant 0 : index
    %c0_16 = arith.constant 0 : index
    %32 = vector.load %arg2[%c1_14, %c0_15, %c0_16] : memref<2x32x128xf32, #tpu.memory_space<vmem>>, vector<1x32x128xf32>
    %33 = vector.shape_cast %32 : vector<1x32x128xf32> to vector<32x128xf32>
    %cst_17 = arith.constant dense<0.000000e+00> : vector<128x32xf32>
    %34 = tpu.matmul %31, %2, %cst_17 {dimension_numbers = #tpu.dot_dimension_numbers<[0], [0], [1], [1], [0, 1, 1, 1], [], []>} : vector<32x128xf32>, vector<32x32xf32>, vector<128x32xf32> -> vector<128x32xf32>
    %cst_18 = arith.constant dense<0.000000e+00> : vector<128x128xf32>
    %35 = tpu.matmul %34, %33, %cst_18 {dimension_numbers = #tpu.dot_dimension_numbers<[1], [0], [0], [1], [0, 0, 1, 1], [], []>} : vector<128x32xf32>, vector<32x128xf32>, vector<128x128xf32> -> vector<128x128xf32>
    %36 = tpu.iota {dimensions = array<i32: 1>} : vector<128x128xi32>
    %c32_i32_19 = arith.constant 32 : i32
    %37 = vector.broadcast %c32_i32_19 : i32 to vector<128x128xi32>
    %38 = arith.cmpi slt, %36, %37 : vector<128x128xi32>
    %cst_20 = arith.constant -1.000000e+30 : f32
    %39 = vector.broadcast %cst_20 : f32 to vector<128x128xf32>
    %40 = arith.select %38, %35, %39 : vector<128x128xi1>, vector<128x128xf32>
    %cst_21 = arith.constant dense<0xFF800000> : vector<128xf32>
    %41 = vector.multi_reduction <maximumf>, %40, %cst_21 [1] : vector<128x128xf32> to vector<128xf32>
    %42 = vector.shape_cast %41 : vector<128xf32> to vector<128x1xf32>
    %43 = vector.broadcast %42 : vector<128x1xf32> to vector<128x128xf32>
    %44 = arith.subf %40, %43 : vector<128x128xf32>
    %45 = math.exp %44 : vector<128x128xf32>
    %cst_22 = arith.constant dense<0.000000e+00> : vector<128xf32>
    %46 = vector.multi_reduction <add>, %45, %cst_22 [1] : vector<128x128xf32> to vector<128xf32>
    %47 = vector.shape_cast %46 : vector<128xf32> to vector<128x1xf32>
    %48 = tpu.reciprocal %47 {approx = true} : vector<128x1xf32> -> vector<128x1xf32>
    %49 = vector.broadcast %48 : vector<128x1xf32> to vector<128x128xf32>
    %50 = arith.mulf %45, %49 : vector<128x128xf32>
    %51 = arith.truncf %50 : vector<128x128xf32> to vector<128x128xbf16>
    %c1_23 = arith.constant 1 : index
    %c0_24 = arith.constant 0 : index
    %c0_25 = arith.constant 0 : index
    %52 = vector.load %arg4[%c1_23, %c0_24, %c0_25] : memref<2x128x128xbf16, #tpu.memory_space<vmem>>, vector<1x128x128xbf16>
    %53 = vector.shape_cast %52 : vector<1x128x128xbf16> to vector<128x128xbf16>
    %54 = vector.shape_cast %51 : vector<128x128xbf16> to vector<1x128x128xbf16>
    tpu.vector_store %arg4[%c1_23, %c0_24, %c0_25], %54 {strides = array<i32>} : memref<2x128x128xbf16, #tpu.memory_space<vmem>>, vector<1x128x128xbf16>,
    return
  }
  func.func @transform_0(%arg0: i32, %arg1: i32) -> (i32, i32, i32) {
    %c0_i32 = arith.constant 0 : i32
    %c0_i32_0 = arith.constant 0 : i32
    %c0_i32_1 = arith.constant 0 : i32
    return %arg0, %c0_i32, %c0_i32_0 : i32, i32, i32
  }
  func.func @transform_1(%arg0: i32, %arg1: i32) -> (i32, i32) {
    %c0_i32 = arith.constant 0 : i32
    %c0_i32_0 = arith.constant 0 : i32
    %c0_i32_1 = arith.constant 0 : i32
    return %c0_i32, %c0_i32_0 : i32, i32
  }
  func.func @transform_2(%arg0: i32, %arg1: i32) -> (i32, i32, i32) {
    %c0_i32 = arith.constant 0 : i32
    %c0_i32_0 = arith.constant 0 : i32
    return %arg0, %arg1, %c0_i32 : i32, i32, i32
  }
}

</mosaic_0001>

<bundles_post_ra>
// kernel: tpu_custom_call.1
= control target key start
LH: loop header
LB: loop body
LE: loop exit
PB: predicated region body
PF: predicated region fallthrough
CT: control target
= control target key end

     0   :  { %7 = vsyncpa [#allocation3], 0  ;;  %s2479_s0 = inlined_call_operand.hbm [shape: f32[2,32,128], index: 0, kind: input, shape index: {}]   ;;  %s2480_s1 = inlined_call_operand.hbm [shape: f32[32,32], index: 1, kind: input, shape index: {}]   ;;  %s2481_s2 = inlined_call_operand.hbm [shape: bf16[2,128,128], index: 2, kind: output, shape index: {}]  }
   0x1   :  { %8 = vsyncpa [#allocation6], 0 }
   0x2   :  { %9 = vsyncpa [#allocation4], 0  ;;  %s2041_s9 = smov [#allocation2]  }
   0x3   :  { %s15_s10 = sshll.u32 %s2041_s9, 4  ;;  %s16_s10 = int_to_ptr.vmem [resolvable:$true] %s15_s10 }
   0x4   :  { %s1983_s11 = scalar_lea.vmem %s16_s10, 1024  ;;  %p1988_p1 = scmp.lt.s32.totalorder %s16_s10, %s16_s10 }
   0x5   :  { %p1984_p0 = scmp.ne.s32.totalorder %s16_s10, %s1983_s11  ;;  %p1989_p2 = scmp.lt.s32.totalorder %s1983_s11, %s1983_s11 }
   0x7   :  { %p1990_p3 = por %p1989_p2, %p1988_p1 }
   0x9   :  { %p1991_p4 = pnand %p1990_p3, %p1984_p0 }
   0xb   :  { %1994 = shalt.err (!%p1991_p4)
}
   0xc   :  { %s2042_s12 = smov 128   ;;  %s2043_s13 = smov 8  }
   0xd   :  { %21 = dma.hbm_to_vmem [thread:$0]  %s2479_s0, 1024, %s16_s10, [#allocation3], %s2042_s12, %s2042_s12, %s2043_s13  }
   0xe   :  { %s2044_s16 = smov [#allocation5]  }
   0xf   :  { %s27_s17 = sshll.u32 %s2044_s16, 4  ;;  %s28_s17 = int_to_ptr.vmem [resolvable:$true] %s27_s17 }
  0x10   :  { %s2003_s18 = scalar_lea.vmem %s28_s17, 512  ;;  %p2008_p6 = scmp.lt.s32.totalorder %s28_s17, %s28_s17 }
  0x11   :  { %p2004_p5 = scmp.ne.s32.totalorder %s28_s17, %s2003_s18  ;;  %p2009_p7 = scmp.lt.s32.totalorder %s2003_s18, %s2003_s18 }
  0x13   :  { %p2010_p8 = por %p2009_p7, %p2008_p6 }
  0x15   :  { %p2011_p9 = pnand %p2010_p8, %p2004_p5 }
  0x17   :  { %2014 = shalt.err (!%p2011_p9)
}
  0x18   :  { %33 = dma.hbm_to_vmem [thread:$0]  %s2480_s1, 512, %s28_s17, [#allocation6], %s2042_s12, %s2042_s12, %s2043_s13  }
  0x19   :  { %2035 = dma.done.wait [#allocation3], 1024  }
  0x1a   :  { %2036 = vsyncadd [#allocation3], 4294966272 }
  0x1b   :  { %2037 = dma.done.wait [#allocation6], 512  }
  0x1c   :  { %2038 = vsyncadd [#allocation6], 4294966784  ;;  %v48_v0 = vld [vmem:[#allocation2] sm:$0xff]  ;;  %v51_v1 = vld [vmem:[#allocation2 + $0x18] sm:$0xff]  ;;  %vm88_vm0 = vcmask 261120   ;;  %s2045_s0 = smov [#allocation7]  }
  0x1d   :  { %56 = vxpose.xlu0.b32.start [1/4] (short) %v48_v0, 128  ;;  %v2069_v2 = vld [vmem:[#allocation2 + $0x20] sm:$0xff]  ;;  %v49_v3 = vld [vmem:[#allocation2 + $0x8] sm:$0xff]  ;;  %v44_v4 = vld [vmem:[#allocation5 + $0x18] sm:$0xff]  ;;  %1743 = vmatprep.subr.mxu1 %v51_v1  ;;  %s1393_s1 = sshll.u32 %s2045_s0, 4  ;;  %s1394_s1 = int_to_ptr.vmem [resolvable:$true] %s1393_s1 }
  0x1e   :  { %729 = vxpose.xlu1.b32.start [1/4] (short) %v2069_v2, 128  ;;  %v50_v5 = vld [vmem:[#allocation2 + $0x10] sm:$0xff]  ;;  %v2072_v6 = vld [vmem:[#allocation2 + $0x28] sm:$0xff]  ;;  %1711 = vmatprep.subr.mxu0 %v44_v4  ;;  %v41_v9 = vld [vmem:[#allocation5] sm:$0xff]  ;;  %s2015_s21 = scalar_lea.vmem %s1394_s1, 2048  ;;  %p2020_p11 = scmp.lt.s32.totalorder %s1394_s1, %s1394_s1 }
  0x1f   :  { %v43_v7 = vld [vmem:[#allocation5 + $0x10] sm:$0xff]  ;;  %1744 = vmatpush3.msra.mxu1 %v51_v1  ;;  %1712 = vmatpush3.msra.mxu0 %v44_v4  ;;  %v42_v8 = vld [vmem:[#allocation5 + $0x8] sm:$0xff]  ;;  %v2078_v11 = vld [vmem:[#allocation2 + $0x38] sm:$0xff]  ;;  %p2016_p10 = scmp.ne.s32.totalorder %s1394_s1, %s2015_s21  ;;  %p2021_p12 = scmp.lt.s32.totalorder %s2015_s21, %s2015_s21 }
  0x20   :  { %1745 = vmatprep.subr.mxu1 %v50_v5  ;;  %1713 = vmatprep.subr.mxu0 %v43_v7  ;;  %v2075_v10 = vld [vmem:[#allocation2 + $0x30] sm:$0xff] }
  0x21   :  { %57 = vxpose.xlu0.b32.cont [2/4] (short) %v49_v3, 128  ;;  %1714 = vmatpush3.msra.mxu0 %v43_v7  ;;  %p2022_p13 = por %p2021_p12, %p2020_p11 }
  0x22   :  { %730 = vxpose.xlu1.b32.cont [2/4] (short) %v2072_v6, 128  ;;  %1715 = vmatprep.subr.mxu0 %v42_v8 }
  0x23   :  { %1746 = vmatpush3.msra.mxu1 %v50_v5  ;;  %1716 = vmatpush3.msra.mxu0 %v42_v8  ;;  %p2023_p0 = pnand %p2022_p13, %p2016_p10 }
  0x24   :  { %1747 = vmatprep.subr.mxu1 %v49_v3  ;;  %1717 = vmatprep.subr.mxu0 %v41_v9 }
  0x25   :  { %58 = vxpose.xlu0.b32.cont [3/4] (short) %v50_v5, 128  ;;  %1718 = vmatpush3.msra.mxu0 %v41_v9 }
  0x26   :  { %731 = vxpose.xlu1.b32.cont [3/4] (short) %v2075_v10, 128  ;;  %1775 = vmatprep.subr.mxu0 %v44_v4 }
  0x27   :  { %1748 = vmatpush3.msra.mxu1 %v49_v3 }
  0x28   :  { %1749 = vmatprep.subr.mxu1 %v48_v0 }
  0x29   :  { %59 = vxpose.xlu0.b32.end [4/4] (short) %v51_v1, 128  ;;  %1750 = vmatpush3.msra.mxu1 %v48_v0 }
  0x2a   :  { %732 = vxpose.xlu1.b32.end [4/4] (short) %v2078_v11, 128  ;;  %1807 = vmatprep.subr.mxu1 %v2078_v11 }
  0x99   :  { %v72_v12 = vpop.trf.xlu0 }
  0x9a   :  { %1719 = vmatprep.mubr.msk.f32.mxu0 %vm88_vm0, %v72_v12  ;;  %v745_v13 = vpop.trf.xlu1  ;;  %v475_v12 = vlaneseq }
  0x9d   :  { %v73_v14 = vpop.trf.xlu0 }
  0x9e   :  { %1720 = vmatmul.mubr.msk.f32.vlgmr.msra.gmra.mxu0 %vm88_vm0, %v73_v14  ;;  %v746_v15 = vpop.trf.xlu1 }
  0x9f   :  { %1776 = vmatpush3.msra.mxu0 %v44_v4 }
  0xa0   :  { %1777 = vmatprep.subr.mxu0 %v43_v7 }
  0xa1   :  { %v74_v16 = vpop.trf.xlu0  ;;  %1778 = vmatpush3.msra.mxu0 %v43_v7 }
  0xa2   :  { %1722 = vmatprep.mubr.msk.f32.mxu0 %vm88_vm0, %v74_v16  ;;  %1779 = vmatprep.subr.mxu0 %v42_v8  ;;  %v747_v18 = vpop.trf.xlu1 }
  0xa3   :  { %1780 = vmatpush3.msra.mxu0 %v42_v8 }
  0xa4   :  { %1781 = vmatprep.subr.mxu0 %v41_v9 }
  0xa5   :  { %v75_v17 = vpop.trf.xlu0  ;;  %1782 = vmatpush3.msra.mxu0 %v41_v9 }
  0xa6   :  { %1723 = vmatmul.mubr.msk.f32.gmra.mxu0 %vm88_vm0, %v75_v17  ;;  %v748_v20 = vpop.trf.xlu1 }
  0xa9   :  { %v76_v19 = vpop.trf.xlu0 }
  0xaa   :  { %1725 = vmatprep.mubr.msk.f32.mxu0 %vm88_vm0, %v76_v19  ;;  %v749_v23 = vpop.trf.xlu1 }
  0xad   :  { %v77_v21 = vpop.trf.xlu0 }
  0xae   :  { %1726 = vmatmul.mubr.msk.f32.gmra.mxu0 %vm88_vm0, %v77_v21  ;;  %v750_v25 = vpop.trf.xlu1 }
  0xb1   :  { %v78_v22 = vpop.trf.xlu0 }
  0xb2   :  { %1728 = vmatprep.mubr.msk.f32.mxu0 %vm88_vm0, %v78_v22  ;;  %v751_v28 = vpop.trf.xlu1 }
  0xb5   :  { %v79_v24 = vpop.trf.xlu0 }
  0xb6   :  { %1729 = vmatmul.mubr.msk.f32.gmra.mxu0 %vm88_vm0, %v79_v24  ;;  %v752_v30 = vpop.trf.xlu1 }
  0xb9   :  { %v80_v26 = vpop.trf.xlu0 }
  0xba   :  { %1731 = vmatprep.mubr.msk.f32.mxu0 %vm88_vm0, %v80_v26  ;;  %v753_v33 = vpop.trf.xlu1 }
  0xbd   :  { %v81_v27 = vpop.trf.xlu0 }
  0xbe   :  { %1732 = vmatmul.mubr.msk.f32.gmra.mxu0 %vm88_vm0, %v81_v27  ;;  %v754_v35 = vpop.trf.xlu1 }
  0xc1   :  { %v82_v29 = vpop.trf.xlu0 }
  0xc2   :  { %1734 = vmatprep.mubr.msk.f32.mxu0 %vm88_vm0, %v82_v29  ;;  %v755_v38 = vpop.trf.xlu1 }
  0xc5   :  { %v83_v31 = vpop.trf.xlu0 }
  0xc6   :  { %1735 = vmatmul.mubr.msk.f32.gmra.mxu0 %vm88_vm0, %v83_v31  ;;  %v756_v39 = vpop.trf.xlu1 }
  0xc9   :  { %v84_v32 = vpop.trf.xlu0 }
  0xca   :  { %1737 = vmatprep.mubr.msk.f32.mxu0 %vm88_vm0, %v84_v32  ;;  %v757_v40 = vpop.trf.xlu1 }
  0xcd   :  { %v85_v34 = vpop.trf.xlu0 }
  0xce   :  { %1738 = vmatmul.mubr.msk.f32.gmra.mxu0 %vm88_vm0, %v85_v34  ;;  %v758_v41 = vpop.trf.xlu1 }
  0xd1   :  { %v86_v36 = vpop.trf.xlu0 }
  0xd2   :  { %1740 = vmatprep.mubr.msk.f32.mxu0 %vm88_vm0, %v86_v36  ;;  %v759_v42 = vpop.trf.xlu1 }
  0xd5   :  { %v87_v37 = vpop.trf.xlu0 }
  0xd6   :  { %1741 = vmatmul.mubr.msk.f32.gmra.mxu0 %vm88_vm0, %v87_v37  ;;  %v760_v43 = vpop.trf.xlu1 }
  0xd7   :  { %1783 = vmatprep.mubr.msk.f32.mxu0 %vm88_vm0, %v745_v13  ;;  %v2153_v13 = vand.u32 127, %v475_v12 }
  0xd9   :  { %vm477_vm1 = vcmp.lt.s32.totalorder %v2153_v13, 32 }
  0xda   :  { %1784 = vmatmul.mubr.msk.f32.vlgmr.msra.gmra.mxu0 %vm88_vm0, %v746_v15 }
  0xdb   :  { %1786 = vmatprep.mubr.msk.f32.mxu0 %vm88_vm0, %v747_v18 }
  0xde   :  { %1787 = vmatmul.mubr.msk.f32.gmra.mxu0 %vm88_vm0, %v748_v20 }
  0xdf   :  { %1789 = vmatprep.mubr.msk.f32.mxu0 %vm88_vm0, %v749_v23 }
  0xe2   :  { %1790 = vmatmul.mubr.msk.f32.gmra.mxu0 %vm88_vm0, %v750_v25 }
  0xe3   :  { %1792 = vmatprep.mubr.msk.f32.mxu0 %vm88_vm0, %v751_v28 }
  0xe6   :  { %1793 = vmatmul.mubr.msk.f32.gmra.mxu0 %vm88_vm0, %v752_v30 }
  0xe7   :  { %1795 = vmatprep.mubr.msk.f32.mxu0 %vm88_vm0, %v753_v33 }
  0xea   :  { %1796 = vmatmul.mubr.msk.f32.gmra.mxu0 %vm88_vm0, %v754_v35 }
  0xeb   :  { %1798 = vmatprep.mubr.msk.f32.mxu0 %vm88_vm0, %v755_v38 }
  0xee   :  { %1799 = vmatmul.mubr.msk.f32.gmra.mxu0 %vm88_vm0, %v756_v39 }
  0xef   :  { %1801 = vmatprep.mubr.msk.f32.mxu0 %vm88_vm0, %v757_v40 }
  0xf2   :  { %1802 = vmatmul.mubr.msk.f32.gmra.mxu0 %vm88_vm0, %v758_v41 }
  0xf3   :  { %1804 = vmatprep.mubr.msk.f32.mxu0 %vm88_vm0, %v759_v42 }
  0xf6   :  { %1805 = vmatmul.mubr.msk.f32.gmra.mxu0 %vm88_vm0, %v760_v43 }
 0x15e   :  { %v1721_v44 = vpop.f32.mrf.mxu0 }
 0x160   :  { %v203_v45 = vpop.f32.mrf.mxu0 }
 0x161   :  { %1751 = vmatprep.mubr.msk.f32.mxu1 %vm88_vm0, %v203_v45 }
 0x162   :  { %1752 = vmatmul.mubr.msk.f32.vlgmr.msra.gmra.mxu1 %vm88_vm0, %v1721_v44 }
 0x163   :  { %1808 = vmatpush3.msra.mxu1 %v2078_v11 }
 0x164   :  { %1809 = vmatprep.subr.mxu1 %v2075_v10 }
 0x165   :  { %1810 = vmatpush3.msra.mxu1 %v2075_v10 }
 0x166   :  { %v1724_v46 = vpop.f32.mrf.mxu0  ;;  %1811 = vmatprep.subr.mxu1 %v2072_v6 }
 0x167   :  { %1812 = vmatpush3.msra.mxu1 %v2072_v6 }
 0x168   :  { %v213_v47 = vpop.f32.mrf.mxu0  ;;  %1813 = vmatprep.subr.mxu1 %v2069_v2 }
 0x169   :  { %1754 = vmatprep.mubr.msk.f32.mxu1 %vm88_vm0, %v213_v47  ;;  %1814 = vmatpush3.msra.mxu1 %v2069_v2 }
 0x16a   :  { %1755 = vmatmul.mubr.msk.f32.gmra.mxu1 %vm88_vm0, %v1724_v46 }
 0x16e   :  { %v1727_v48 = vpop.f32.mrf.mxu0 }
 0x170   :  { %v223_v49 = vpop.f32.mrf.mxu0 }
 0x171   :  { %1757 = vmatprep.mubr.msk.f32.mxu1 %vm88_vm0, %v223_v49 }
 0x172   :  { %1758 = vmatmul.mubr.msk.f32.gmra.mxu1 %vm88_vm0, %v1727_v48 }
 0x176   :  { %v1730_v50 = vpop.f32.mrf.mxu0 }
 0x178   :  { %v233_v51 = vpop.f32.mrf.mxu0 }
 0x179   :  { %1760 = vmatprep.mubr.msk.f32.mxu1 %vm88_vm0, %v233_v51 }
 0x17a   :  { %1761 = vmatmul.mubr.msk.f32.gmra.mxu1 %vm88_vm0, %v1730_v50 }
 0x17e   :  { %v1733_v52 = vpop.f32.mrf.mxu0 }
 0x180   :  { %v243_v53 = vpop.f32.mrf.mxu0 }
 0x181   :  { %1763 = vmatprep.mubr.msk.f32.mxu1 %vm88_vm0, %v243_v53 }
 0x182   :  { %1764 = vmatmul.mubr.msk.f32.gmra.mxu1 %vm88_vm0, %v1733_v52 }
 0x186   :  { %v1736_v54 = vpop.f32.mrf.mxu0 }
 0x188   :  { %v253_v55 = vpop.f32.mrf.mxu0 }
 0x189   :  { %1766 = vmatprep.mubr.msk.f32.mxu1 %vm88_vm0, %v253_v55 }
 0x18a   :  { %1767 = vmatmul.mubr.msk.f32.gmra.mxu1 %vm88_vm0, %v1736_v54 }
 0x18e   :  { %v1739_v56 = vpop.f32.mrf.mxu0 }
 0x190   :  { %v263_v57 = vpop.f32.mrf.mxu0 }
 0x191   :  { %1769 = vmatprep.mubr.msk.f32.mxu1 %vm88_vm0, %v263_v57 }
 0x192   :  { %1770 = vmatmul.mubr.msk.f32.gmra.mxu1 %vm88_vm0, %v1739_v56 }
 0x196   :  { %v1742_v58 = vpop.f32.mrf.mxu0 }
 0x198   :  { %v273_v59 = vpop.f32.mrf.mxu0 }
 0x199   :  { %1772 = vmatprep.mubr.msk.f32.mxu1 %vm88_vm0, %v273_v59 }
 0x19a   :  { %1773 = vmatmul.mubr.msk.f32.gmra.mxu1 %vm88_vm0, %v1742_v58  ;;  %v1785_v60 = vpop.f32.mrf.mxu0 }
 0x19c   :  { %v875_v61 = vpop.f32.mrf.mxu0 }
 0x19d   :  { %1815 = vmatprep.mubr.msk.f32.mxu1 %vm88_vm0, %v875_v61 }
 0x19e   :  { %v1788_v62 = vpop.f32.mrf.mxu0  ;;  %1816 = vmatmul.mubr.msk.f32.vlgmr.msra.gmra.mxu1 %vm88_vm0, %v1785_v60 }
 0x1a0   :  { %v885_v63 = vpop.f32.mrf.mxu0 }
 0x1a1   :  { %1818 = vmatprep.mubr.msk.f32.mxu1 %vm88_vm0, %v885_v63 }
 0x1a2   :  { %v1791_v0 = vpop.f32.mrf.mxu0  ;;  %1819 = vmatmul.mubr.msk.f32.gmra.mxu1 %vm88_vm0, %v1788_v62 }
 0x1a4   :  { %v895_v1 = vpop.f32.mrf.mxu0 }
 0x1a5   :  { %1821 = vmatprep.mubr.msk.f32.mxu1 %vm88_vm0, %v895_v1 }
 0x1a6   :  { %v1794_v2 = vpop.f32.mrf.mxu0  ;;  %1822 = vmatmul.mubr.msk.f32.gmra.mxu1 %vm88_vm0, %v1791_v0 }
 0x1a8   :  { %v905_v3 = vpop.f32.mrf.mxu0 }
 0x1a9   :  { %1824 = vmatprep.mubr.msk.f32.mxu1 %vm88_vm0, %v905_v3 }
 0x1aa   :  { %v1797_v4 = vpop.f32.mrf.mxu0  ;;  %1825 = vmatmul.mubr.msk.f32.gmra.mxu1 %vm88_vm0, %v1794_v2 }
 0x1ac   :  { %v915_v5 = vpop.f32.mrf.mxu0 }
 0x1ad   :  { %1827 = vmatprep.mubr.msk.f32.mxu1 %vm88_vm0, %v915_v5 }
 0x1ae   :  { %v1800_v6 = vpop.f32.mrf.mxu0  ;;  %1828 = vmatmul.mubr.msk.f32.gmra.mxu1 %vm88_vm0, %v1797_v4 }
 0x1b0   :  { %v925_v7 = vpop.f32.mrf.mxu0 }
 0x1b1   :  { %1830 = vmatprep.mubr.msk.f32.mxu1 %vm88_vm0, %v925_v7 }
 0x1b2   :  { %v1803_v8 = vpop.f32.mrf.mxu0  ;;  %1831 = vmatmul.mubr.msk.f32.gmra.mxu1 %vm88_vm0, %v1800_v6 }
 0x1b4   :  { %v935_v9 = vpop.f32.mrf.mxu0 }
 0x1b5   :  { %1833 = vmatprep.mubr.msk.f32.mxu1 %vm88_vm0, %v935_v9 }
 0x1b6   :  { %v1806_v10 = vpop.f32.mrf.mxu0  ;;  %1834 = vmatmul.mubr.msk.f32.gmra.mxu1 %vm88_vm0, %v1803_v8 }
 0x1b8   :  { %v945_v11 = vpop.f32.mrf.mxu0 }
 0x1b9   :  { %1836 = vmatprep.mubr.msk.f32.mxu1 %vm88_vm0, %v945_v11 }
 0x1ba   :  { %1837 = vmatmul.mubr.msk.f32.gmra.mxu1 %vm88_vm0, %v1806_v10 }
 0x222   :  { %v1753_v14 = vpop.f32.mrf.mxu1 }
 0x223   :  { %v2158_v15 = vsel %vm477_vm1, %v1753_v14, -1e+30 }
 0x224   :  { %496 = vmax.xlane.f32.xlu1 %v2158_v15  ;;  %v396_v16 = vpop.f32.mrf.mxu1 }
 0x225   :  { %v2163_v17 = vsel %vm477_vm1, %v396_v16, -1e+30 }
 0x226   :  { %494 = vmax.xlane.f32.xlu0 %v2163_v17 }
 0x22a   :  { %v1756_v18 = vpop.f32.mrf.mxu1 }
 0x22b   :  { %v2168_v19 = vsel %vm477_vm1, %v1756_v18, -1e+30 }
 0x22c   :  { %500 = vmax.xlane.f32.xlu1 %v2168_v19  ;;  %v406_v20 = vpop.f32.mrf.mxu1 }
 0x22d   :  { %v2173_v21 = vsel %vm477_vm1, %v406_v20, -1e+30 }
 0x230   :  { %498 = vmax.xlane.f32.xlu1 %v2173_v21 }
 0x232   :  { %v1759_v22 = vpop.f32.mrf.mxu1 }
 0x233   :  { %v2178_v23 = vsel %vm477_vm1, %v1759_v22, -1e+30 }
 0x234   :  { %504 = vmax.xlane.f32.xlu1 %v2178_v23  ;;  %v416_v24 = vpop.f32.mrf.mxu1 }
 0x235   :  { %v2183_v25 = vsel %vm477_vm1, %v416_v24, -1e+30 }
 0x236   :  { %502 = vmax.xlane.f32.xlu0 %v2183_v25 }
 0x23a   :  { %v1762_v26 = vpop.f32.mrf.mxu1 }
 0x23b   :  { %v2188_v27 = vsel %vm477_vm1, %v1762_v26, -1e+30 }
 0x23c   :  { %508 = vmax.xlane.f32.xlu1 %v2188_v27  ;;  %v426_v28 = vpop.f32.mrf.mxu1 }
 0x23d   :  { %v2193_v29 = vsel %vm477_vm1, %v426_v28, -1e+30 }
 0x23e   :  { %506 = vmax.xlane.f32.xlu0 %v2193_v29 }
 0x242   :  { %v1765_v30 = vpop.f32.mrf.mxu1 }
 0x243   :  { %v2198_v31 = vsel %vm477_vm1, %v1765_v30, -1e+30 }
 0x244   :  { %512 = vmax.xlane.f32.xlu1 %v2198_v31  ;;  %v436_v32 = vpop.f32.mrf.mxu1 }
 0x245   :  { %v2203_v33 = vsel %vm477_vm1, %v436_v32, -1e+30 }
 0x246   :  { %510 = vmax.xlane.f32.xlu0 %v2203_v33 }
 0x24a   :  { %v1768_v34 = vpop.f32.mrf.mxu1 }
 0x24b   :  { %v2208_v35 = vsel %vm477_vm1, %v1768_v34, -1e+30 }
 0x24c   :  { %516 = vmax.xlane.f32.xlu1 %v2208_v35  ;;  %v446_v36 = vpop.f32.mrf.mxu1 }
 0x24d   :  { %v2213_v37 = vsel %vm477_vm1, %v446_v36, -1e+30 }
 0x24e   :  { %514 = vmax.xlane.f32.xlu0 %v2213_v37 }
 0x252   :  { %v1771_v38 = vpop.f32.mrf.mxu1 }
 0x253   :  { %v2218_v39 = vsel %vm477_vm1, %v1771_v38, -1e+30 }
 0x254   :  { %520 = vmax.xlane.f32.xlu1 %v2218_v39  ;;  %v456_v40 = vpop.f32.mrf.mxu1 }
 0x255   :  { %v2223_v41 = vsel %vm477_vm1, %v456_v40, -1e+30 }
 0x256   :  { %518 = vmax.xlane.f32.xlu0 %v2223_v41 }
 0x25a   :  { %v1774_v42 = vpop.f32.mrf.mxu1 }
 0x25b   :  { %v2228_v43 = vsel %vm477_vm1, %v1774_v42, -1e+30 }
 0x25c   :  { %524 = vmax.xlane.f32.xlu1 %v2228_v43  ;;  %v466_v44 = vpop.f32.mrf.mxu1 }
 0x25d   :  { %v2233_v45 = vsel %vm477_vm1, %v466_v44, -1e+30 }
 0x25e   :  { %v1817_v46 = vpop.f32.mrf.mxu1  ;;  %522 = vmax.xlane.f32.xlu0 %v2233_v45 }
 0x25f   :  { %v2238_v47 = vsel %vm477_vm1, %v1817_v46, -1e+30 }
 0x260   :  { %1165 = vmax.xlane.f32.xlu1 %v2238_v47  ;;  %v1068_v48 = vpop.f32.mrf.mxu1 }
 0x261   :  { %v2243_v49 = vsel %vm477_vm1, %v1068_v48, -1e+30 }
 0x262   :  { %v1820_v50 = vpop.f32.mrf.mxu1  ;;  %1163 = vmax.xlane.f32.xlu0 %v2243_v49 }
 0x263   :  { %v2248_v51 = vsel %vm477_vm1, %v1820_v50, -1e+30 }
 0x264   :  { %1169 = vmax.xlane.f32.xlu1 %v2248_v51  ;;  %v1078_v52 = vpop.f32.mrf.mxu1 }
 0x265   :  { %v2253_v53 = vsel %vm477_vm1, %v1078_v52, -1e+30 }
 0x266   :  { %v1823_v54 = vpop.f32.mrf.mxu1  ;;  %1167 = vmax.xlane.f32.xlu0 %v2253_v53 }
 0x267   :  { %v2258_v55 = vsel %vm477_vm1, %v1823_v54, -1e+30 }
 0x268   :  { %1173 = vmax.xlane.f32.xlu1 %v2258_v55  ;;  %v1088_v56 = vpop.f32.mrf.mxu1 }
 0x269   :  { %v2263_v57 = vsel %vm477_vm1, %v1088_v56, -1e+30 }
 0x26a   :  { %v1826_v58 = vpop.f32.mrf.mxu1  ;;  %1171 = vmax.xlane.f32.xlu0 %v2263_v57 }
 0x26b   :  { %v2268_v59 = vsel %vm477_vm1, %v1826_v58, -1e+30 }
 0x26c   :  { %1177 = vmax.xlane.f32.xlu1 %v2268_v59  ;;  %v1098_v60 = vpop.f32.mrf.mxu1 }
 0x26d   :  { %v2273_v61 = vsel %vm477_vm1, %v1098_v60, -1e+30 }
 0x26e   :  { %v1829_v62 = vpop.f32.mrf.mxu1  ;;  %1175 = vmax.xlane.f32.xlu0 %v2273_v61 }
 0x26f   :  { %v2278_v63 = vsel %vm477_vm1, %v1829_v62, -1e+30 }
 0x270   :  { %1181 = vmax.xlane.f32.xlu1 %v2278_v63  ;;  %v1108_v0 = vpop.f32.mrf.mxu1 }
 0x271   :  { %v2283_v1 = vsel %vm477_vm1, %v1108_v0, -1e+30 }
 0x272   :  { %v1832_v2 = vpop.f32.mrf.mxu1  ;;  %1179 = vmax.xlane.f32.xlu0 %v2283_v1 }
 0x273   :  { %v2288_v3 = vsel %vm477_vm1, %v1832_v2, -1e+30 }
 0x274   :  { %1185 = vmax.xlane.f32.xlu1 %v2288_v3  ;;  %v1118_v4 = vpop.f32.mrf.mxu1 }
 0x275   :  { %v2293_v5 = vsel %vm477_vm1, %v1118_v4, -1e+30 }
 0x276   :  { %v1835_v6 = vpop.f32.mrf.mxu1  ;;  %1183 = vmax.xlane.f32.xlu0 %v2293_v5 }
 0x277   :  { %v2298_v7 = vsel %vm477_vm1, %v1835_v6, -1e+30 }
 0x278   :  { %1189 = vmax.xlane.f32.xlu1 %v2298_v7  ;;  %v1128_v8 = vpop.f32.mrf.mxu1 }
 0x279   :  { %v2303_v9 = vsel %vm477_vm1, %v1128_v8, -1e+30 }
 0x27a   :  { %v1838_v10 = vpop.f32.mrf.mxu1  ;;  %1187 = vmax.xlane.f32.xlu0 %v2303_v9 }
 0x27b   :  { %v2308_v11 = vsel %vm477_vm1, %v1838_v10, -1e+30 }
 0x27c   :  { %1193 = vmax.xlane.f32.xlu1 %v2308_v11  ;;  %v1138_v12 = vpop.f32.mrf.mxu1 }
 0x27d   :  { %v2313_v14 = vsel %vm477_vm1, %v1138_v12, -1e+30 }
 0x27e   :  { %1191 = vmax.xlane.f32.xlu0 %v2313_v14 }
 0x2ad   :  { %v497_v16 = vpop.xlane.xlu1 %496 }
 0x2ae   :  { %v527_v18 = vsub.f32 %v2158_v15, %v497_v16 }
 0x2af   :  { %v495_v20 = vpop.xlane.xlu0 %494 }
 0x2b0   :  { %v544_v22 = vmul.f32 1.442695, %v527_v18  ;;  %v526_v24 = vsub.f32 %v2163_v17, %v495_v20 }
 0x2b2   :  { %1847 = vpow2.f32 %v544_v22  ;;  %v542_v26 = vmul.f32 1.442695, %v526_v24 }
 0x2b4   :  { %1849 = vpow2.f32 %v542_v26 }
 0x2b5   :  { %v501_v28 = vpop.xlane.xlu1 %500 }
 0x2b6   :  { %v529_v30 = vsub.f32 %v2168_v19, %v501_v28 }
 0x2b8   :  { %v548_v32 = vmul.f32 1.442695, %v529_v30 }
 0x2b9   :  { %v499_v34 = vpop.xlane.xlu1 %498 }
 0x2ba   :  { %1851 = vpow2.f32 %v548_v32  ;;  %v528_v13 = vsub.f32 %v2173_v21, %v499_v34 }
 0x2bc   :  { %v546_v36 = vmul.f32 1.442695, %v528_v13 }
 0x2bd   :  { %v505_v38 = vpop.xlane.xlu1 %504 }
 0x2be   :  { %1853 = vpow2.f32 %v546_v36  ;;  %v531_v15 = vsub.f32 %v2178_v23, %v505_v38 }
 0x2bf   :  { %v2321_v40 = vpop.eup %1847  ;;  %v503_v42 = vpop.xlane.xlu0 %502 }
 0x2c0   :  { %v552_v17 = vmul.f32 1.442695, %v531_v15  ;;  %v530_v44 = vsub.f32 %v2183_v25, %v503_v42  ;;  %576 = vadd.xlane.f32.xlu1 %v2321_v40 }
 0x2c1   :  { %v2325_v46 = vpop.eup %1849 }
 0x2c2   :  { %1855 = vpow2.f32 %v552_v17  ;;  %v550_v19 = vmul.f32 1.442695, %v530_v44  ;;  %574 = vadd.xlane.f32.xlu0 %v2325_v46 }
 0x2c4   :  { %1857 = vpow2.f32 %v550_v19 }
 0x2c5   :  { %v509_v21 = vpop.xlane.xlu1 %508 }
 0x2c6   :  { %v533_v48 = vsub.f32 %v2188_v27, %v509_v21 }
 0x2c7   :  { %v2329_v50 = vpop.eup %1851  ;;  %v507_v23 = vpop.xlane.xlu0 %506 }
 0x2c8   :  { %v556_v52 = vmul.f32 1.442695, %v533_v48  ;;  %v532_v54 = vsub.f32 %v2193_v29, %v507_v23  ;;  %580 = vadd.xlane.f32.xlu1 %v2329_v50 }
 0x2ca   :  { %1859 = vpow2.f32 %v556_v52  ;;  %v554_v25 = vmul.f32 1.442695, %v532_v54 }
 0x2cb   :  { %v2333_v56 = vpop.eup %1853 }
 0x2cc   :  { %1861 = vpow2.f32 %v554_v25  ;;  %578 = vadd.xlane.f32.xlu0 %v2333_v56 }
 0x2cd   :  { %v513_v58 = vpop.xlane.xlu1 %512 }
 0x2ce   :  { %v535_v60 = vsub.f32 %v2198_v31, %v513_v58 }
 0x2cf   :  { %v2337_v62 = vpop.eup %1855  ;;  %v511_v27 = vpop.xlane.xlu0 %510 }
 0x2d0   :  { %v560_v0 = vmul.f32 1.442695, %v535_v60  ;;  %v534_v2 = vsub.f32 %v2203_v33, %v511_v27  ;;  %584 = vadd.xlane.f32.xlu1 %v2337_v62 }
 0x2d1   :  { %v2341_v29 = vpop.eup %1857 }
 0x2d2   :  { %1863 = vpow2.f32 %v560_v0  ;;  %v558_v4 = vmul.f32 1.442695, %v534_v2  ;;  %582 = vadd.xlane.f32.xlu0 %v2341_v29 }
 0x2d4   :  { %1865 = vpow2.f32 %v558_v4 }
 0x2d5   :  { %v517_v6 = vpop.xlane.xlu1 %516 }
 0x2d6   :  { %v537_v8 = vsub.f32 %v2208_v35, %v517_v6 }
 0x2d7   :  { %v2345_v10 = vpop.eup %1859  ;;  %v515_v31 = vpop.xlane.xlu0 %514 }
 0x2d8   :  { %v564_v12 = vmul.f32 1.442695, %v537_v8  ;;  %v536_v16 = vsub.f32 %v2213_v37, %v515_v31  ;;  %588 = vadd.xlane.f32.xlu1 %v2345_v10 }
 0x2d9   :  { %v2349_v33 = vpop.eup %1861 }
 0x2da   :  { %1867 = vpow2.f32 %v564_v12  ;;  %v562_v18 = vmul.f32 1.442695, %v536_v16  ;;  %586 = vadd.xlane.f32.xlu0 %v2349_v33 }
 0x2dc   :  { %1869 = vpow2.f32 %v562_v18 }
 0x2dd   :  { %v521_v20 = vpop.xlane.xlu1 %520 }
 0x2de   :  { %v539_v22 = vsub.f32 %v2218_v39, %v521_v20 }
 0x2df   :  { %v2353_v24 = vpop.eup %1863  ;;  %v519_v35 = vpop.xlane.xlu0 %518 }
 0x2e0   :  { %v568_v26 = vmul.f32 1.442695, %v539_v22  ;;  %v538_v28 = vsub.f32 %v2223_v41, %v519_v35  ;;  %592 = vadd.xlane.f32.xlu1 %v2353_v24 }
 0x2e1   :  { %v2357_v37 = vpop.eup %1865 }
 0x2e2   :  { %1871 = vpow2.f32 %v568_v26  ;;  %v566_v30 = vmul.f32 1.442695, %v538_v28  ;;  %590 = vadd.xlane.f32.xlu0 %v2357_v37 }
 0x2e4   :  { %1873 = vpow2.f32 %v566_v30 }
 0x2e5   :  { %v525_v32 = vpop.xlane.xlu1 %524 }
 0x2e6   :  { %v541_v34 = vsub.f32 %v2228_v43, %v525_v32 }
 0x2e7   :  { %v2361_v13 = vpop.eup %1867  ;;  %v523_v39 = vpop.xlane.xlu0 %522 }
 0x2e8   :  { %v572_v36 = vmul.f32 1.442695, %v541_v34  ;;  %v540_v38 = vsub.f32 %v2233_v45, %v523_v39  ;;  %596 = vadd.xlane.f32.xlu1 %v2361_v13 }
 0x2e9   :  { %v2365_v41 = vpop.eup %1869  ;;  %v1166_v15 = vpop.xlane.xlu1 %1165 }
 0x2ea   :  { %1875 = vpow2.f32 %v572_v36  ;;  %v570_v42 = vmul.f32 1.442695, %v540_v38  ;;  %v1196_v17 = vsub.f32 %v2238_v47, %v1166_v15  ;;  %594 = vadd.xlane.f32.xlu0 %v2365_v41 }
 0x2eb   :  { %v1164_v44 = vpop.xlane.xlu0 %1163 }
 0x2ec   :  { %1877 = vpow2.f32 %v570_v42  ;;  %v1213_v43 = vmul.f32 1.442695, %v1196_v17  ;;  %v1195_v19 = vsub.f32 %v2243_v49, %v1164_v44 }
 0x2ed   :  { %v1170_v21 = vpop.xlane.xlu1 %1169 }
 0x2ee   :  { %1879 = vpow2.f32 %v1213_v43  ;;  %v1211_v48 = vmul.f32 1.442695, %v1195_v19  ;;  %v1198_v45 = vsub.f32 %v2248_v51, %v1170_v21 }
 0x2ef   :  { %v2371_v23 = vpop.eup %1871  ;;  %v1168_v52 = vpop.xlane.xlu0 %1167 }
 0x2f0   :  { %1881 = vpow2.f32 %v1211_v48  ;;  %v1217_v54 = vmul.f32 1.442695, %v1198_v45  ;;  %v1197_v25 = vsub.f32 %v2253_v53, %v1168_v52  ;;  %600 = vadd.xlane.f32.xlu1 %v2371_v23 }
 0x2f1   :  { %v2375_v47 = vpop.eup %1873  ;;  %v1174_v58 = vpop.xlane.xlu1 %1173 }
 0x2f2   :  { %1883 = vpow2.f32 %v1217_v54  ;;  %v1215_v60 = vmul.f32 1.442695, %v1197_v25  ;;  %v1200_v49 = vsub.f32 %v2258_v55, %v1174_v58  ;;  %598 = vadd.xlane.f32.xlu0 %v2375_v47 }
 0x2f3   :  { %v1172_v27 = vpop.xlane.xlu0 %1171 }
 0x2f4   :  { %1885 = vpow2.f32 %v1215_v60  ;;  %v1221_v51 = vmul.f32 1.442695, %v1200_v49  ;;  %v1199_v0 = vsub.f32 %v2263_v57, %v1172_v27 }
 0x2f5   :  { %v1178_v2 = vpop.xlane.xlu1 %1177 }
 0x2f6   :  { %1887 = vpow2.f32 %v1221_v51  ;;  %v1219_v4 = vmul.f32 1.442695, %v1199_v0  ;;  %v1202_v53 = vsub.f32 %v2268_v59, %v1178_v2 }
 0x2f7   :  { %v2381_v6 = vpop.eup %1875  ;;  %v1176_v8 = vpop.xlane.xlu0 %1175 }
 0x2f8   :  { %1889 = vpow2.f32 %v1219_v4  ;;  %v1225_v31 = vmul.f32 1.442695, %v1202_v53  ;;  %v1201_v12 = vsub.f32 %v2273_v61, %v1176_v8  ;;  %604 = vadd.xlane.f32.xlu1 %v2381_v6 }
 0x2f9   :  { %v2385_v55 = vpop.eup %1877  ;;  %v1182_v16 = vpop.xlane.xlu1 %1181 }
 0x2fa   :  { %1891 = vpow2.f32 %v1225_v31  ;;  %v1223_v18 = vmul.f32 1.442695, %v1201_v12  ;;  %v1204_v57 = vsub.f32 %v2278_v63, %v1182_v16  ;;  %602 = vadd.xlane.f32.xlu0 %v2385_v55 }
 0x2fb   :  { %v2389_v20 = vpop.eup %1879  ;;  %v1180_v59 = vpop.xlane.xlu0 %1179 }
 0x2fc   :  { %1893 = vpow2.f32 %v1223_v18  ;;  %v1229_v22 = vmul.f32 1.442695, %v1204_v57  ;;  %v1203_v35 = vsub.f32 %v2283_v1, %v1180_v59  ;;  %1245 = vadd.xlane.f32.xlu1 %v2389_v20 }
 0x2fd   :  { %v2393_v61 = vpop.eup %1881  ;;  %v1186_v26 = vpop.xlane.xlu1 %1185 }
 0x2fe   :  { %1895 = vpow2.f32 %v1229_v22  ;;  %v1227_v28 = vmul.f32 1.442695, %v1203_v35  ;;  %v1206_v30 = vsub.f32 %v2288_v3, %v1186_v26  ;;  %1243 = vadd.xlane.f32.xlu0 %v2393_v61 }
 0x2ff   :  { %v2397_v63 = vpop.eup %1883  ;;  %v1184_v32 = vpop.xlane.xlu0 %1183 }
 0x300   :  { %1897 = vpow2.f32 %v1227_v28  ;;  %v1233_v34 = vmul.f32 1.442695, %v1206_v30  ;;  %v1205_v39 = vsub.f32 %v2293_v5, %v1184_v32  ;;  %1249 = vadd.xlane.f32.xlu1 %v2397_v63 }
 0x301   :  { %v2401_v1 = vpop.eup %1885  ;;  %v1190_v36 = vpop.xlane.xlu1 %1189 }
 0x302   :  { %1899 = vpow2.f32 %v1233_v34  ;;  %v1231_v38 = vmul.f32 1.442695, %v1205_v39  ;;  %v1208_v15 = vsub.f32 %v2298_v7, %v1190_v36  ;;  %1247 = vadd.xlane.f32.xlu0 %v2401_v1 }
 0x303   :  { %v2405_v3 = vpop.eup %1887  ;;  %v1188_v42 = vpop.xlane.xlu0 %1187 }
 0x304   :  { %1901 = vpow2.f32 %v1231_v38  ;;  %v1237_v17 = vmul.f32 1.442695, %v1208_v15  ;;  %v1207_v44 = vsub.f32 %v2303_v9, %v1188_v42  ;;  %1253 = vadd.xlane.f32.xlu1 %v2405_v3 }
 0x305   :  { %v2409_v5 = vpop.eup %1889  ;;  %v1194_v43 = vpop.xlane.xlu1 %1193 }
 0x306   :  { %1903 = vpow2.f32 %v1237_v17  ;;  %v1235_v19 = vmul.f32 1.442695, %v1207_v44  ;;  %v1210_v21 = vsub.f32 %v2308_v11, %v1194_v43  ;;  %1251 = vadd.xlane.f32.xlu0 %v2409_v5 }
 0x307   :  { %v2413_v7 = vpop.eup %1891  ;;  %v1192_v48 = vpop.xlane.xlu0 %1191 }
 0x308   :  { %1905 = vpow2.f32 %v1235_v19  ;;  %v1241_v45 = vmul.f32 1.442695, %v1210_v21  ;;  %v1209_v52 = vsub.f32 %v2313_v14, %v1192_v48  ;;  %1257 = vadd.xlane.f32.xlu1 %v2413_v7 }
 0x309   :  { %v2417_v9 = vpop.eup %1893 }
 0x30a   :  { %1907 = vpow2.f32 %v1241_v45  ;;  %v1239_v54 = vmul.f32 1.442695, %v1209_v52  ;;  %1255 = vadd.xlane.f32.xlu0 %v2417_v9 }
 0x30b   :  { %v2420_v25 = vpop.eup %1895 }
 0x30c   :  { %1909 = vpow2.f32 %v1239_v54  ;;  %1261 = vadd.xlane.f32.xlu1 %v2420_v25 }
 0x30d   :  { %v2423_v11 = vpop.eup %1897 }
 0x30e   :  { %1259 = vadd.xlane.f32.xlu0 %v2423_v11 }
 0x30f   :  { %v2426_v58 = vpop.eup %1899 }
 0x310   :  { %1265 = vadd.xlane.f32.xlu1 %v2426_v58 }
 0x311   :  { %v2429_v14 = vpop.eup %1901 }
 0x312   :  { %1263 = vadd.xlane.f32.xlu0 %v2429_v14 }
 0x313   :  { %v2432_v60 = vpop.eup %1903 }
 0x314   :  { %1269 = vadd.xlane.f32.xlu1 %v2432_v60 }
 0x315   :  { %v2435_v49 = vpop.eup %1905 }
 0x316   :  { %1267 = vadd.xlane.f32.xlu0 %v2435_v49 }
 0x317   :  { %v2438_v27 = vpop.eup %1907 }
 0x318   :  { %1273 = vadd.xlane.f32.xlu1 %v2438_v27 }
 0x319   :  { %v2441_v51 = vpop.eup %1909 }
 0x31a   :  { %1271 = vadd.xlane.f32.xlu0 %v2441_v51 }
 0x349   :  { %v577_v0 = vpop.xlane.xlu1 %576 }
 0x34a   :  { %1911 = vrcp.f32 %v577_v0 }
 0x34b   :  { %v575_v2 = vpop.xlane.xlu0 %574 }
 0x34c   :  { %1913 = vrcp.f32 %v575_v2 }
 0x351   :  { %v581_v4 = vpop.xlane.xlu1 %580 }
 0x352   :  { %1915 = vrcp.f32 %v581_v4 }
 0x355   :  { %v579_v53 = vpop.xlane.xlu0 %578 }
 0x356   :  { %1917 = vrcp.f32 %v579_v53 }
 0x357   :  { %v1912_v8 = vpop.eup %1911 }
 0x358   :  { %v623_v16 = vmul.f32 %v1912_v8, %v2321_v40 }
 0x359   :  { %v1914_v31 = vpop.eup %1913  ;;  %v585_v12 = vpop.xlane.xlu1 %584 }
 0x35a   :  { %v622_v18 = vmul.f32 %v1914_v31, %v2325_v46  ;;  %1919 = vrcp.f32 %v585_v12 }
 0x35b   :  { %v583_v57 = vpop.xlane.xlu0 %582 }
 0x35c   :  { %v1540_v59 = vpack.c.bf16 %v623_v16, %v622_v18  ;;  %1921 = vrcp.f32 %v583_v57 }
 0x35e   :  { %1541 = vst [vmem:[#allocation7] sm:$0xff] %v1540_v59  }
 0x35f   :  { %v1916_v22 = vpop.eup %1915 }
 0x360   :  { %v625_v30 = vmul.f32 %v1916_v22, %v2329_v50 }
 0x361   :  { %v589_v35 = vpop.xlane.xlu1 %588 }
 0x362   :  { %1923 = vrcp.f32 %v589_v35 }
 0x363   :  { %v1918_v26 = vpop.eup %1917  ;;  %v587_v28 = vpop.xlane.xlu0 %586 }
 0x364   :  { %v624_v32 = vmul.f32 %v1918_v26, %v2333_v56  ;;  %1925 = vrcp.f32 %v587_v28 }
 0x366   :  { %v1545_v34 = vpack.c.bf16 %v625_v30, %v624_v32 }
 0x367   :  { %v1920_v39 = vpop.eup %1919 }
 0x368   :  { %1617 = vst [vmem:[#allocation7 + $0x8] sm:$0xff] %v1545_v34   ;;  %v627_v36 = vmul.f32 %v1920_v39, %v2337_v62 }
 0x369   :  { %v1922_v40 = vpop.eup %1921  ;;  %v593_v46 = vpop.xlane.xlu1 %592 }
 0x36a   :  { %v626_v38 = vmul.f32 %v1922_v40, %v2341_v29  ;;  %1927 = vrcp.f32 %v593_v46 }
 0x36b   :  { %v591_v15 = vpop.xlane.xlu0 %590 }
 0x36c   :  { %v1550_v42 = vpack.c.bf16 %v627_v36, %v626_v38  ;;  %1929 = vrcp.f32 %v591_v15 }
 0x36e   :  { %1618 = vst [vmem:[#allocation7 + $0x10] sm:$0xff] %v1550_v42  }
 0x36f   :  { %v1924_v17 = vpop.eup %1923 }
 0x370   :  { %v629_v56 = vmul.f32 %v1924_v17, %v2345_v10 }
 0x371   :  { %v1926_v44 = vpop.eup %1925  ;;  %v597_v50 = vpop.xlane.xlu1 %596 }
 0x372   :  { %v628_v43 = vmul.f32 %v1926_v44, %v2349_v33  ;;  %1931 = vrcp.f32 %v597_v50 }
 0x373   :  { %v595_v19 = vpop.xlane.xlu0 %594 }
 0x374   :  { %v1555_v21 = vpack.c.bf16 %v629_v56, %v628_v43  ;;  %1933 = vrcp.f32 %v595_v19 }
 0x376   :  { %1619 = vst [vmem:[#allocation7 + $0x18] sm:$0xff] %v1555_v21  }
 0x377   :  { %v1928_v62 = vpop.eup %1927 }
 0x378   :  { %v631_v45 = vmul.f32 %v1928_v62, %v2353_v24 }
 0x379   :  { %v1930_v48 = vpop.eup %1929  ;;  %v601_v29 = vpop.xlane.xlu1 %600 }
 0x37a   :  { %v630_v52 = vmul.f32 %v1930_v48, %v2357_v37  ;;  %1935 = vrcp.f32 %v601_v29 }
 0x37b   :  { %v599_v54 = vpop.xlane.xlu0 %598 }
 0x37c   :  { %v1560_v0 = vpack.c.bf16 %v631_v45, %v630_v52  ;;  %1937 = vrcp.f32 %v599_v54 }
 0x37e   :  { %1620 = vst [vmem:[#allocation7 + $0x20] sm:$0xff] %v1560_v0  }
 0x37f   :  { %v1932_v10 = vpop.eup %1931 }
 0x380   :  { %v633_v4 = vmul.f32 %v1932_v10, %v2361_v13 }
 0x381   :  { %v1934_v2 = vpop.eup %1933  ;;  %v605_v33 = vpop.xlane.xlu1 %604 }
 0x382   :  { %v632_v53 = vmul.f32 %v1934_v2, %v2365_v41  ;;  %1939 = vrcp.f32 %v605_v33 }
 0x383   :  { %v603_v8 = vpop.xlane.xlu0 %602 }
 0x384   :  { %v1565_v31 = vpack.c.bf16 %v633_v4, %v632_v53  ;;  %1941 = vrcp.f32 %v603_v8 }
 0x385   :  { %v1246_v12 = vpop.xlane.xlu1 %1245 }
 0x386   :  { %1621 = vst [vmem:[#allocation7 + $0x28] sm:$0xff] %v1565_v31   ;;  %1943 = vrcp.f32 %v1246_v12 }
 0x387   :  { %v1936_v24 = vpop.eup %1935  ;;  %v1244_v37 = vpop.xlane.xlu0 %1243 }
 0x388   :  { %1945 = vrcp.f32 %v1244_v37  ;;  %v635_v57 = vmul.f32 %v1936_v24, %v2371_v23 }
 0x389   :  { %v1938_v16 = vpop.eup %1937  ;;  %v1250_v18 = vpop.xlane.xlu1 %1249 }
 0x38a   :  { %v634_v59 = vmul.f32 %v1938_v16, %v2375_v47  ;;  %1947 = vrcp.f32 %v1250_v18 }
 0x38b   :  { %v1248_v13 = vpop.xlane.xlu0 %1247 }
 0x38c   :  { %v1570_v22 = vpack.c.bf16 %v635_v57, %v634_v59  ;;  %1949 = vrcp.f32 %v1248_v13 }
 0x38d   :  { %v1254_v41 = vpop.xlane.xlu1 %1253 }
 0x38e   :  { %1622 = vst [vmem:[#allocation7 + $0x30] sm:$0xff] %v1570_v22   ;;  %1951 = vrcp.f32 %v1254_v41 }
 0x38f   :  { %v1940_v35 = vpop.eup %1939  ;;  %v1252_v26 = vpop.xlane.xlu0 %1251 }
 0x390   :  { %1953 = vrcp.f32 %v1252_v26  ;;  %v637_v32 = vmul.f32 %v1940_v35, %v2381_v6 }
 0x391   :  { %v1942_v28 = vpop.eup %1941  ;;  %v1258_v30 = vpop.xlane.xlu1 %1257 }
 0x392   :  { %v636_v34 = vmul.f32 %v1942_v28, %v2385_v55  ;;  %1955 = vrcp.f32 %v1258_v30 }
 0x393   :  { %v1944_v23 = vpop.eup %1943  ;;  %v1256_v39 = vpop.xlane.xlu0 %1255 }
 0x394   :  { %v1575_v47 = vpack.c.bf16 %v637_v32, %v636_v34  ;;  %1957 = vrcp.f32 %v1256_v39  ;;  %v1292_v36 = vmul.f32 %v1944_v23, %v2389_v20 }
 0x395   :  { %v1946_v40 = vpop.eup %1945  ;;  %v1262_v46 = vpop.xlane.xlu1 %1261 }
 0x396   :  { %1623 = vst [vmem:[#allocation7 + $0x38] sm:$0xff] %v1575_v47   ;;  %v1291_v38 = vmul.f32 %v1946_v40, %v2393_v61  ;;  %1959 = vrcp.f32 %v1262_v46 }
 0x397   :  { %v1948_v15 = vpop.eup %1947  ;;  %v1260_v42 = vpop.xlane.xlu0 %1259 }
 0x398   :  { %v1580_v17 = vpack.c.bf16 %v1292_v36, %v1291_v38  ;;  %1961 = vrcp.f32 %v1260_v42  ;;  %v1294_v55 = vmul.f32 %v1948_v15, %v2397_v63 }
 0x399   :  { %v1950_v6 = vpop.eup %1949  ;;  %v1266_v44 = vpop.xlane.xlu1 %1265 }
 0x39a   :  { %1581 = vst [vmem:[#allocation7 + $0x40] sm:$0xff] %v1580_v17   ;;  %v1293_v50 = vmul.f32 %v1950_v6, %v2401_v1  ;;  %1963 = vrcp.f32 %v1266_v44 }
 0x39b   :  { %v1952_v56 = vpop.eup %1951  ;;  %v1264_v43 = vpop.xlane.xlu0 %1263 }
 0x39c   :  { %v1585_v19 = vpack.c.bf16 %v1294_v55, %v1293_v50  ;;  %1965 = vrcp.f32 %v1264_v43  ;;  %v1296_v61 = vmul.f32 %v1952_v56, %v2405_v3 }
 0x39d   :  { %v1954_v20 = vpop.eup %1953  ;;  %v1270_v21 = vpop.xlane.xlu1 %1269 }
 0x39e   :  { %1624 = vst [vmem:[#allocation7 + $0x48] sm:$0xff] %v1585_v19   ;;  %v1295_v62 = vmul.f32 %v1954_v20, %v2409_v5  ;;  %1967 = vrcp.f32 %v1270_v21 }
 0x39f   :  { %v1956_v48 = vpop.eup %1955  ;;  %v1268_v29 = vpop.xlane.xlu0 %1267 }
 0x3a0   :  { %v1590_v45 = vpack.c.bf16 %v1296_v61, %v1295_v62  ;;  %1969 = vrcp.f32 %v1268_v29  ;;  %v1298_v1 = vmul.f32 %v1956_v48, %v2413_v7 }
 0x3a1   :  { %v1958_v63 = vpop.eup %1957  ;;  %v1274_v52 = vpop.xlane.xlu1 %1273 }
 0x3a2   :  { %1625 = vst [vmem:[#allocation7 + $0x50] sm:$0xff] %v1590_v45   ;;  %v1297_v54 = vmul.f32 %v1958_v63, %v2417_v9  ;;  %1971 = vrcp.f32 %v1274_v52 }
 0x3a3   :  { %v1960_v0 = vpop.eup %1959  ;;  %v1272_v10 = vpop.xlane.xlu0 %1271 }
 0x3a4   :  { %v1595_v2 = vpack.c.bf16 %v1298_v1, %v1297_v54  ;;  %1973 = vrcp.f32 %v1272_v10  ;;  %v1300_v5 = vmul.f32 %v1960_v0, %v2420_v25 }
 0x3a5   :  { %v1962_v3 = vpop.eup %1961 }
 0x3a6   :  { %1626 = vst [vmem:[#allocation7 + $0x58] sm:$0xff] %v1595_v2   ;;  %v1299_v33 = vmul.f32 %v1962_v3, %v2423_v11 }
 0x3a7   :  { %v1964_v4 = vpop.eup %1963 }
 0x3a8   :  { %v1600_v53 = vpack.c.bf16 %v1300_v5, %v1299_v33  ;;  %v1302_v31 = vmul.f32 %v1964_v4, %v2426_v58 }
 0x3a9   :  { %v1966_v8 = vpop.eup %1965 }
 0x3aa   :  { %1627 = vst [vmem:[#allocation7 + $0x60] sm:$0xff] %v1600_v53   ;;  %v1301_v7 = vmul.f32 %v1966_v8, %v2429_v14 }
 0x3ab   :  { %v1968_v9 = vpop.eup %1967 }
 0x3ac   :  { %v1605_v12 = vpack.c.bf16 %v1302_v31, %v1301_v7  ;;  %v1304_v37 = vmul.f32 %v1968_v9, %v2432_v60 }
 0x3ad   :  { %v1970_v24 = vpop.eup %1969 }
 0x3ae   :  { %1628 = vst [vmem:[#allocation7 + $0x68] sm:$0xff] %v1605_v12   ;;  %v1303_v16 = vmul.f32 %v1970_v24, %v2435_v49 }
 0x3af   :  { %v1972_v18 = vpop.eup %1971 }
 0x3b0   :  { %v1610_v25 = vpack.c.bf16 %v1304_v37, %v1303_v16  ;;  %v1306_v57 = vmul.f32 %v1972_v18, %v2438_v27 }
 0x3b1   :  { %v1974_v11 = vpop.eup %1973 }
 0x3b2   :  { %1629 = vst [vmem:[#allocation7 + $0x70] sm:$0xff] %v1610_v25   ;;  %v1305_v58 = vmul.f32 %v1974_v11, %v2441_v51 }
 0x3b4   :  { %v1615_v14 = vpack.c.bf16 %v1306_v57, %v1305_v58 }
 0x3b6   :  { %1630 = vst [vmem:[#allocation7 + $0x78] sm:$0xff] %v1615_v14  }
 0x3b7   :  { %2026 = shalt.err (!%p2023_p0)
}
 0x3b8   :  { %s2046_s22 = smov 64   ;;  %s2047_s23 = smov 4  }
 0x3b9   :  { %1399 = dma.vmem_to_hbm [thread:$0]  %s1394_s1, 2048, %s2481_s2, [#allocation4], %s2046_s22, %s2046_s22, %s2047_s23  }
 0x3ba   :  { %2039 = dma.done.wait [#allocation4], 2048  }
 0x3bb   :  { %2040 = vsyncadd [#allocation4], 4294965248 }
 0x3bc   :  { %1403 = vsyncpa [#allocation3], 1 }
 0x3bd   :  { %1404 = vsyncpa [#allocation6], 1 }
 0x3be   :  { %1405 = vsyncpa [#allocation4], 1 }

</bundles_post_ra>
